<compile_context>
chip_gen: v7x
topology: tpu7x:2x2x1
jax: 0.10.0
libtpu: 0.0.40
codegen_flags: <defaults>
</compile_context>

<pallas_src>
import functools

import jax
import jax.numpy as jnp
from jax.experimental import pallas as pl
from jax.experimental.pallas import tpu as pltpu

_NEG_BIG = -3.4028235e38  # Python float (NOT a jnp array -> no captured const)


def _gsa_kernel(feat_ref, bid_ref,
                w1_ref, b1_ref,
                w2_ref, b2_ref,
                w3_ref, b3_ref, s3_ref, t3_ref,
                out_ref, acc_ref, *, num_segments, num_seg_pad):
    """Per-tile fused MLP (Lin->ReLU->[folded BN])x3 + running segment-max."""
    step = pl.program_id(1)

    @pl.when(step == 0)
    def _init():
        acc_ref[...] = jnp.full(acc_ref.shape, _NEG_BIG, acc_ref.dtype)

    # ---- Layer 1: single K=(c_in+3) bf16 dot (inputs pre-packed in HBM). ----
    h = jnp.dot(feat_ref[...], w1_ref[...], preferred_element_type=jnp.float32)
    h = jnp.maximum(h + b1_ref[...], 0.0)

    # ---- Layer 2 (BN1 folded into W2/b2 in the wrapper). ----
    h = jnp.dot(h.astype(jnp.bfloat16), w2_ref[...],
                preferred_element_type=jnp.float32)
    h = jnp.maximum(h + b2_ref[...], 0.0)

    # ---- Layer 3 (BN2 folded into W3/b3); final BN applied explicitly. ----
    h = jnp.dot(h.astype(jnp.bfloat16), w3_ref[...],
                preferred_element_type=jnp.float32)
    h = jnp.maximum(h + b3_ref[...], 0.0)
    h = h * s3_ref[...] + t3_ref[...]                 # (tile_n, c_out) f32

    # ---- Per-tile segment max, then ONE full-tile accumulator update. ----
    bid = bid_ref[...]                                # (tile_n, 1) int32, -1=pad
    rows = [jnp.max(jnp.where(bid == b, h, _NEG_BIG), axis=0, keepdims=True)
            for b in range(num_segments)]             # static unroll, tiny
    if num_seg_pad > num_segments:
        rows.append(jnp.full((num_seg_pad - num_segments, h.shape[1]),
                             _NEG_BIG, jnp.float32))
    tile_max = jnp.concatenate(rows, axis=0)          # (num_seg_pad, c_out)
    acc_ref[...] = jnp.maximum(acc_ref[...], tile_max)

    @pl.when(step == pl.num_programs(1) - 1)
    def _finalize():
        out_ref[...] = acc_ref[...]


def _round_up(v, m):
    return (v + m - 1) // m * m


def global_sa_module(x, pos, batch, params, num_segments, *,
                     tile_n=2048, core_splits=2):
    """JAX wrapper reproducing GlobalSAModule.forward (eval-mode BN).

    x:     (N, C)  float32
    pos:   (N, 3)  float32
    batch: (N,)    int32, segment ids in [0, num_segments)
    params: list of 3 dicts with keys W (Cout, Cin), b, gamma, beta, mean, var
    returns (x_out (B, C_out3), pos_out (B, 3) zeros, batch_out (B,) arange)
    """
    n, c_in = x.shape
    c_out = params[-1]["W"].shape[0]
    c_tot = c_in + 3
    eps = 1e-5

    # ---- Parameter prep (plain JAX, tiny): BN folding + bf16 weights. ----
    def bn_affine(p):
        s = p["gamma"] / jnp.sqrt(p["var"] + eps)
        t = p["beta"] - p["mean"] * s
        return s.astype(jnp.float32), t.astype(jnp.float32)

    wt = [jnp.transpose(p["W"]).astype(jnp.float32) for p in params]  # (Cin,Cout)
    bb = [p["b"].astype(jnp.float32) for p in params]
    s1, t1 = bn_affine(params[0])
    s2, t2 = bn_affine(params[1])
    s3, t3 = bn_affine(params[2])

    # Fold BN_i (i=1,2) into layer i+1's Linear: (r*s + t) @ W = r @ (s*W) + t@W
    wt2 = s1[:, None] * wt[1]
    b2 = bb[1] + t1 @ wt[1]
    wt3 = s2[:, None] * wt[2]
    b3 = bb[2] + t2 @ wt[2]

    weight_args = [
        wt[0].astype(jnp.bfloat16),      # W1  (c_in+3, h1)
        bb[0].reshape(1, -1),
        wt2.astype(jnp.bfloat16),        # W2  (h1, h2)
        b2.reshape(1, -1),
        wt3.astype(jnp.bfloat16),        # W3  (h2, h3)
        b3.reshape(1, -1),
        s3.reshape(1, -1),
        t3.reshape(1, -1),
    ]

    # ---- Fused input prep: concat + bf16 cast + pad the point axis. ----
    splits = max(1, int(core_splits))
    tile_n = max(8, min(tile_n, _round_up(-(-n // splits), 8)))
    n_pad = _round_up(n, splits * tile_n)
    pad = n_pad - n
    feat_in = jnp.concatenate(
        [x.astype(jnp.float32), pos.astype(jnp.float32)], axis=1
    ).astype(jnp.bfloat16)
    feat_in = jnp.pad(feat_in, ((0, pad), (0, 0)))               # (n_pad, c_tot)
    bid = jnp.pad(batch.astype(jnp.int32), (0, pad),
                  constant_values=-1).reshape(n_pad, 1)          # -1 = padding

    steps = n_pad // (splits * tile_n)
    num_seg_pad = _round_up(num_segments, 8)

    grid = (splits, steps)
    in_specs = [
        pl.BlockSpec((tile_n, c_tot), lambda c, i: (c * steps + i, 0)),
        pl.BlockSpec((tile_n, 1), lambda c, i: (c * steps + i, 0)),
    ] + [pl.BlockSpec(a.shape, lambda c, i: (0, 0)) for a in weight_args]

    out = pl.pallas_call(
        functools.partial(_gsa_kernel, num_segments=num_segments,
                          num_seg_pad=num_seg_pad),
        grid=grid,
        in_specs=in_specs,
        out_specs=pl.BlockSpec((None, num_seg_pad, c_out),
                               lambda c, i: (c, 0, 0)),
        out_shape=jax.ShapeDtypeStruct((splits, num_seg_pad, c_out),
                                       jnp.float32),
        scratch_shapes=[pltpu.VMEM((num_seg_pad, c_out), jnp.float32)],
        compiler_params=pltpu.CompilerParams(
            dimension_semantics=("parallel", "arbitrary"),
            vmem_limit_bytes=48 * 1024 * 1024),
    )(feat_in, bid, *weight_args)

    feat = jnp.max(out, axis=0)[:num_segments]   # combine per-core partial maxes
    pos_out = jnp.zeros((num_segments, 3), dtype=pos.dtype)
    batch_out = jnp.arange(num_segments, dtype=batch.dtype)
    return feat, pos_out, batch_out


def _make_params(key, channels):
    """Deterministic init for MLP([c0, c1, c2, c3]) = (Lin->ReLU->BN) x 3."""
    params = []
    for i in range(1, len(channels)):
        cin, cout = channels[i - 1], channels[i]
        key, kw, kb, kg, kbe = jax.random.split(key, 5)
        bound = 1.0 / jnp.sqrt(cin)
        params.append(dict(
            W=jax.random.uniform(kw, (cout, cin), jnp.float32, -bound, bound),
            b=jax.random.uniform(kb, (cout,), jnp.float32, -bound, bound),
            gamma=1.0 + 0.1 * jax.random.normal(kg, (cout,), jnp.float32),
            beta=0.1 * jax.random.normal(kbe, (cout,), jnp.float32),
            mean=jnp.zeros((cout,), jnp.float32),   # BN running stats at init
            var=jnp.ones((cout,), jnp.float32),
        ))
    return params


def _reference(x, pos, batch, params, num_segments):
    """Pure-JAX f32 reference for sanity checking."""
    h = jnp.concatenate([x, pos], axis=1)
    eps = 1e-5
    for p in params:
        h = jnp.maximum(h @ p["W"].T + p["b"], 0.0)
        h = (h - p["mean"]) / jnp.sqrt(p["var"] + eps) * p["gamma"] + p["beta"]
    out = jnp.full((num_segments, h.shape[1]), _NEG_BIG, jnp.float32)
    for b in range(num_segments):
        m = (batch == b)[:, None]
        out = out.at[b].set(jnp.max(jnp.where(m, h, _NEG_BIG), axis=0))
    return out


if __name__ == "__main__":
    key = jax.random.PRNGKey(0)
    k_x, k_pos, k_p = jax.random.split(key, 3)

    # Small synthetic point cloud: 2 graphs of 32 points each, 13 features.
    N, C, B = 64, 13, 2
    hidden = [C + 3, 32, 64, 128]

    x = jax.random.normal(k_x, (N, C), jnp.float32)
    pos = jax.random.normal(k_pos, (N, 3), jnp.float32)
    batch = jnp.repeat(jnp.arange(B, dtype=jnp.int32), N // B)

    params = _make_params(k_p, hidden)

    feat, pos_out, batch_out = global_sa_module(x, pos, batch, params, B)
    jax.block_until_ready((feat, pos_out, batch_out))

    ref = _reference(x, pos, batch, params, B)
    assert feat.shape == (B, hidden[-1])
    assert pos_out.shape == (B, 3) and bool(jnp.all(pos_out == 0))
    assert bool(jnp.all(batch_out == jnp.arange(B)))
    # bf16 MXU operands (f32 accumulate) -> loosen tolerance vs the f32 reference.
    assert bool(jnp.allclose(feat, ref, atol=3e-2, rtol=3e-2)), (
        float(jnp.max(jnp.abs(feat - ref))))

    print("KERNEL_OK")
</pallas_src>

<mosaic_0001>
module attributes {stable_mosaic.version = 11 : i64} {
  func.func @_gsa_kernel(%arg0: i32, %arg1: i32, %arg2: memref<32x16xbf16, #tpu.memory_space<vmem>>, %arg3: memref<32x1xi32, #tpu.memory_space<vmem>>, %arg4: memref<16x32xbf16, #tpu.memory_space<vmem>>, %arg5: memref<1x32xf32, #tpu.memory_space<vmem>>, %arg6: memref<32x64xbf16, #tpu.memory_space<vmem>>, %arg7: memref<1x64xf32, #tpu.memory_space<vmem>>, %arg8: memref<64x128xbf16, #tpu.memory_space<vmem>>, %arg9: memref<1x128xf32, #tpu.memory_space<vmem>>, %arg10: memref<1x128xf32, #tpu.memory_space<vmem>>, %arg11: memref<1x128xf32, #tpu.memory_space<vmem>>, %arg12: memref<1x8x128xf32, #tpu.memory_space<vmem>>, %arg13: memref<8x128xf32, #tpu.memory_space<vmem>>) attributes {dimension_semantics = [#tpu.dimension_semantics<parallel>, #tpu.dimension_semantics<arbitrary>], iteration_bounds = array<i64: 2, 1>, scalar_prefetch = 0 : i64, scratch_operands = 1 : i64, tpu.core_type = #tpu.core_type<tc>, window_params = [{transform_indices = @transform_0, window_bounds = array<i64: 32, 16>}, {transform_indices = @transform_1, window_bounds = array<i64: 32, 1>}, {pipeline_mode = #tpu.pipeline_mode<synchronous>, transform_indices = @transform_2, window_bounds = array<i64: 16, 32>}, {pipeline_mode = #tpu.pipeline_mode<synchronous>, transform_indices = @transform_3, window_bounds = array<i64: 1, 32>}, {pipeline_mode = #tpu.pipeline_mode<synchronous>, transform_indices = @transform_4, window_bounds = array<i64: 32, 64>}, {pipeline_mode = #tpu.pipeline_mode<synchronous>, transform_indices = @transform_5, window_bounds = array<i64: 1, 64>}, {pipeline_mode = #tpu.pipeline_mode<synchronous>, transform_indices = @transform_6, window_bounds = array<i64: 64, 128>}, {pipeline_mode = #tpu.pipeline_mode<synchronous>, transform_indices = @transform_7, window_bounds = array<i64: 1, 128>}, {pipeline_mode = #tpu.pipeline_mode<synchronous>, transform_indices = @transform_8, window_bounds = array<i64: 1, 128>}, {pipeline_mode = #tpu.pipeline_mode<synchronous>, transform_indices = @transform_9, window_bounds = array<i64: 1, 128>}, {transform_indices = @transform_10, window_bounds = array<i64: 1, 8, 128>}]} {
    %c0_i32 = arith.constant 0 : i32
    %0 = arith.cmpi eq, %arg1, %c0_i32 : i32
    %1 = arith.extui %0 : i1 to i32
    %c0_i32_0 = arith.constant 0 : i32
    %2 = arith.cmpi ne, %1, %c0_i32_0 : i32
    scf.if %2 {
      %cst_37 = arith.constant -3.40282347E+38 : f32
      %58 = vector.broadcast %cst_37 : f32 to vector<8x128xf32>
      %c0_38 = arith.constant 0 : index
      %c0_39 = arith.constant 0 : index
      %59 = vector.load %arg13[%c0_38, %c0_39] : memref<8x128xf32, #tpu.memory_space<vmem>>, vector<8x128xf32>
      tpu.vector_store %arg13[%c0_38, %c0_39], %58 {strides = array<i32>} : memref<8x128xf32, #tpu.memory_space<vmem>>, vector<8x128xf32>,
    } else {
    }
    %c0 = arith.constant 0 : index
    %c0_1 = arith.constant 0 : index
    %3 = vector.load %arg2[%c0, %c0_1] : memref<32x16xbf16, #tpu.memory_space<vmem>>, vector<32x16xbf16>
    %c0_2 = arith.constant 0 : index
    %c0_3 = arith.constant 0 : index
    %4 = vector.load %arg4[%c0_2, %c0_3] : memref<16x32xbf16, #tpu.memory_space<vmem>>, vector<16x32xbf16>
    %cst = arith.constant dense<0.000000e+00> : vector<32x32xf32>
    %5 = tpu.matmul %3, %4, %cst {dimension_numbers = #tpu.dot_dimension_numbers<[1], [0], [0], [1], [0, 0, 1, 1], [], []>} : vector<32x16xbf16>, vector<16x32xbf16>, vector<32x32xf32> -> vector<32x32xf32>
    %c0_4 = arith.constant 0 : index
    %c0_5 = arith.constant 0 : index
    %6 = vector.load %arg5[%c0_4, %c0_5] : memref<1x32xf32, #tpu.memory_space<vmem>>, vector<1x32xf32>
    %7 = vector.broadcast %6 : vector<1x32xf32> to vector<32x32xf32>
    %8 = arith.addf %5, %7 : vector<32x32xf32>
    %cst_6 = arith.constant 0.000000e+00 : f32
    %9 = vector.broadcast %cst_6 : f32 to vector<32x32xf32>
    %10 = arith.maximumf %8, %9 : vector<32x32xf32>
    %11 = arith.truncf %10 : vector<32x32xf32> to vector<32x32xbf16>
    %c0_7 = arith.constant 0 : index
    %c0_8 = arith.constant 0 : index
    %12 = vector.load %arg6[%c0_7, %c0_8] : memref<32x64xbf16, #tpu.memory_space<vmem>>, vector<32x64xbf16>
    %cst_9 = arith.constant dense<0.000000e+00> : vector<32x64xf32>
    %13 = tpu.matmul %11, %12, %cst_9 {dimension_numbers = #tpu.dot_dimension_numbers<[1], [0], [0], [1], [0, 0, 1, 1], [], []>} : vector<32x32xbf16>, vector<32x64xbf16>, vector<32x64xf32> -> vector<32x64xf32>
    %c0_10 = arith.constant 0 : index
    %c0_11 = arith.constant 0 : index
    %14 = vector.load %arg7[%c0_10, %c0_11] : memref<1x64xf32, #tpu.memory_space<vmem>>, vector<1x64xf32>
    %15 = vector.broadcast %14 : vector<1x64xf32> to vector<32x64xf32>
    %16 = arith.addf %13, %15 : vector<32x64xf32>
    %cst_12 = arith.constant 0.000000e+00 : f32
    %17 = vector.broadcast %cst_12 : f32 to vector<32x64xf32>
    %18 = arith.maximumf %16, %17 : vector<32x64xf32>
    %19 = arith.truncf %18 : vector<32x64xf32> to vector<32x64xbf16>
    %c0_13 = arith.constant 0 : index
    %c0_14 = arith.constant 0 : index
    %20 = vector.load %arg8[%c0_13, %c0_14] : memref<64x128xbf16, #tpu.memory_space<vmem>>, vector<64x128xbf16>
    %cst_15 = arith.constant dense<0.000000e+00> : vector<32x128xf32>
    %21 = tpu.matmul %19, %20, %cst_15 {dimension_numbers = #tpu.dot_dimension_numbers<[1], [0], [0], [1], [0, 0, 1, 1], [], []>} : vector<32x64xbf16>, vector<64x128xbf16>, vector<32x128xf32> -> vector<32x128xf32>
    %c0_16 = arith.constant 0 : index
    %c0_17 = arith.constant 0 : index
    %22 = vector.load %arg9[%c0_16, %c0_17] : memref<1x128xf32, #tpu.memory_space<vmem>>, vector<1x128xf32>
    %23 = vector.broadcast %22 : vector<1x128xf32> to vector<32x128xf32>
    %24 = arith.addf %21, %23 : vector<32x128xf32>
    %cst_18 = arith.constant 0.000000e+00 : f32
    %25 = vector.broadcast %cst_18 : f32 to vector<32x128xf32>
    %26 = arith.maximumf %24, %25 : vector<32x128xf32>
    %c0_19 = arith.constant 0 : index
    %c0_20 = arith.constant 0 : index
    %27 = vector.load %arg10[%c0_19, %c0_20] : memref<1x128xf32, #tpu.memory_space<vmem>>, vector<1x128xf32>
    %28 = vector.broadcast %27 : vector<1x128xf32> to vector<32x128xf32>
    %29 = arith.mulf %26, %28 : vector<32x128xf32>
    %c0_21 = arith.constant 0 : index
    %c0_22 = arith.constant 0 : index
    %30 = vector.load %arg11[%c0_21, %c0_22] : memref<1x128xf32, #tpu.memory_space<vmem>>, vector<1x128xf32>
    %31 = vector.broadcast %30 : vector<1x128xf32> to vector<32x128xf32>
    %32 = arith.addf %29, %31 : vector<32x128xf32>
    %c0_23 = arith.constant 0 : index
    %c0_24 = arith.constant 0 : index
    %33 = vector.load %arg3[%c0_23, %c0_24] : memref<32x1xi32, #tpu.memory_space<vmem>>, vector<32x1xi32>
    %c0_i32_25 = arith.constant 0 : i32
    %34 = vector.broadcast %c0_i32_25 : i32 to vector<32x1xi32>
    %35 = arith.cmpi eq, %33, %34 : vector<32x1xi32>
    %cst_26 = arith.constant -3.40282347E+38 : f32
    %36 = vector.shape_cast %35 : vector<32x1xi1> to vector<32x1xi1>
    %37 = vector.broadcast %36 : vector<32x1xi1> to vector<32x128xi1>
    %38 = vector.broadcast %cst_26 : f32 to vector<32x128xf32>
    %39 = arith.select %37, %32, %38 : vector<32x128xi1>, vector<32x128xf32>
    %cst_27 = arith.constant dense<0xFF800000> : vector<128xf32>
    %40 = vector.multi_reduction <maximumf>, %39, %cst_27 [0] : vector<32x128xf32> to vector<128xf32>
    %41 = vector.shape_cast %40 : vector<128xf32> to vector<1x128xf32>
    %c1_i32 = arith.constant 1 : i32
    %42 = vector.broadcast %c1_i32 : i32 to vector<32x1xi32>
    %43 = arith.cmpi eq, %33, %42 : vector<32x1xi32>
    %cst_28 = arith.constant -3.40282347E+38 : f32
    %44 = vector.shape_cast %43 : vector<32x1xi1> to vector<32x1xi1>
    %45 = vector.broadcast %44 : vector<32x1xi1> to vector<32x128xi1>
    %46 = vector.broadcast %cst_28 : f32 to vector<32x128xf32>
    %47 = arith.select %45, %32, %46 : vector<32x128xi1>, vector<32x128xf32>
    %cst_29 = arith.constant dense<0xFF800000> : vector<128xf32>
    %48 = vector.multi_reduction <maximumf>, %47, %cst_29 [0] : vector<32x128xf32> to vector<128xf32>
    %49 = vector.shape_cast %48 : vector<128xf32> to vector<1x128xf32>
    %cst_30 = arith.constant -3.40282347E+38 : f32
    %50 = vector.broadcast %cst_30 : f32 to vector<6x128xf32>
    %51 = tpu.concatenate %41, %49, %50 in 0 : vector<1x128xf32>, vector<1x128xf32>, vector<6x128xf32> -> vector<8x128xf32>
    %c0_31 = arith.constant 0 : index
    %c0_32 = arith.constant 0 : index
    %52 = vector.load %arg13[%c0_31, %c0_32] : memref<8x128xf32, #tpu.memory_space<vmem>>, vector<8x128xf32>
    %53 = arith.maximumf %52, %51 : vector<8x128xf32>
    %c0_33 = arith.constant 0 : index
    %c0_34 = arith.constant 0 : index
    %54 = vector.load %arg13[%c0_33, %c0_34] : memref<8x128xf32, #tpu.memory_space<vmem>>, vector<8x128xf32>
    tpu.vector_store %arg13[%c0_33, %c0_34], %53 {strides = array<i32>} : memref<8x128xf32, #tpu.memory_space<vmem>>, vector<8x128xf32>,
    %c0_i32_35 = arith.constant 0 : i32
    %55 = arith.cmpi eq, %arg1, %c0_i32_35 : i32
    %56 = arith.extui %55 : i1 to i32
    %c0_i32_36 = arith.constant 0 : i32
    %57 = arith.cmpi ne, %56, %c0_i32_36 : i32
    scf.if %57 {
      %c0_37 = arith.constant 0 : index
      %c0_38 = arith.constant 0 : index
      %58 = vector.load %arg13[%c0_37, %c0_38] : memref<8x128xf32, #tpu.memory_space<vmem>>, vector<8x128xf32>
      %c0_39 = arith.constant 0 : index
      %c0_40 = arith.constant 0 : index
      %c0_41 = arith.constant 0 : index
      %59 = vector.load %arg12[%c0_39, %c0_40, %c0_41] : memref<1x8x128xf32, #tpu.memory_space<vmem>>, vector<1x8x128xf32>
      %60 = vector.shape_cast %59 : vector<1x8x128xf32> to vector<8x128xf32>
      %61 = vector.shape_cast %58 : vector<8x128xf32> to vector<1x8x128xf32>
      tpu.vector_store %arg12[%c0_39, %c0_40, %c0_41], %61 {strides = array<i32>} : memref<1x8x128xf32, #tpu.memory_space<vmem>>, vector<1x8x128xf32>,
    } else {
    }
    return
  }
  func.func @transform_0(%arg0: i32, %arg1: i32) -> (i32, i32) {
    %c1_i32 = arith.constant 1 : i32
    %0 = arith.muli %arg0, %c1_i32 : i32
    %1 = arith.addi %0, %arg1 : i32
    %c0_i32 = arith.constant 0 : i32
    %c0_i32_0 = arith.constant 0 : i32
    return %1, %c0_i32 : i32, i32
  }
  func.func @transform_1(%arg0: i32, %arg1: i32) -> (i32, i32) {
    %c1_i32 = arith.constant 1 : i32
    %0 = arith.muli %arg0, %c1_i32 : i32
    %1 = arith.addi %0, %arg1 : i32
    %c0_i32 = arith.constant 0 : i32
    %c0_i32_0 = arith.constant 0 : i32
    return %1, %c0_i32 : i32, i32
  }
  func.func @transform_2(%arg0: i32, %arg1: i32) -> (i32, i32) {
    %c0_i32 = arith.constant 0 : i32
    %c0_i32_0 = arith.constant 0 : i32
    %c0_i32_1 = arith.constant 0 : i32
    return %c0_i32, %c0_i32_0 : i32, i32
  }
  func.func @transform_3(%arg0: i32, %arg1: i32) -> (i32, i32) {
    %c0_i32 = arith.constant 0 : i32
    %c0_i32_0 = arith.constant 0 : i32
    %c0_i32_1 = arith.constant 0 : i32
    return %c0_i32, %c0_i32_0 : i32, i32
  }
  func.func @transform_4(%arg0: i32, %arg1: i32) -> (i32, i32) {
    %c0_i32 = arith.constant 0 : i32
    %c0_i32_0 = arith.constant 0 : i32
    %c0_i32_1 = arith.constant 0 : i32
    return %c0_i32, %c0_i32_0 : i32, i32
  }
  func.func @transform_5(%arg0: i32, %arg1: i32) -> (i32, i32) {
    %c0_i32 = arith.constant 0 : i32
    %c0_i32_0 = arith.constant 0 : i32
    %c0_i32_1 = arith.constant 0 : i32
    return %c0_i32, %c0_i32_0 : i32, i32
  }
  func.func @transform_6(%arg0: i32, %arg1: i32) -> (i32, i32) {
    %c0_i32 = arith.constant 0 : i32
    %c0_i32_0 = arith.constant 0 : i32
    %c0_i32_1 = arith.constant 0 : i32
    return %c0_i32, %c0_i32_0 : i32, i32
  }
  func.func @transform_7(%arg0: i32, %arg1: i32) -> (i32, i32) {
    %c0_i32 = arith.constant 0 : i32
    %c0_i32_0 = arith.constant 0 : i32
    %c0_i32_1 = arith.constant 0 : i32
    return %c0_i32, %c0_i32_0 : i32, i32
  }
  func.func @transform_8(%arg0: i32, %arg1: i32) -> (i32, i32) {
    %c0_i32 = arith.constant 0 : i32
    %c0_i32_0 = arith.constant 0 : i32
    %c0_i32_1 = arith.constant 0 : i32
    return %c0_i32, %c0_i32_0 : i32, i32
  }
  func.func @transform_9(%arg0: i32, %arg1: i32) -> (i32, i32) {
    %c0_i32 = arith.constant 0 : i32
    %c0_i32_0 = arith.constant 0 : i32
    %c0_i32_1 = arith.constant 0 : i32
    return %c0_i32, %c0_i32_0 : i32, i32
  }
  func.func @transform_10(%arg0: i32, %arg1: i32) -> (i32, i32, i32) {
    %c0_i32 = arith.constant 0 : i32
    %c0_i32_0 = arith.constant 0 : i32
    %c0_i32_1 = arith.constant 0 : i32
    return %arg0, %c0_i32, %c0_i32_0 : i32, i32, i32
  }
}

</mosaic_0001>

<bundles_post_ra>
// kernel: tpu_custom_call.1
= control target key start
LH: loop header
LB: loop body
LE: loop exit
PB: predicated region body
PF: predicated region fallthrough
CT: control target
= control target key end

     0   :  { %s1329_s0 = inlined_call_operand.vmem [shape: bf16[64,16], index: 0, kind: input, shape index: {}]   ;;  %s1330_s1 = inlined_call_operand.vmem [shape: s32[64,1], index: 1, kind: input, shape index: {}]   ;;  %s1331_s2 = inlined_call_operand.vmem [shape: bf16[16,32], index: 2, kind: input, shape index: {}]   ;;  %s1332_s3 = inlined_call_operand.vmem [shape: f32[1,32], index: 3, kind: input, shape index: {}]   ;;  %s1333_s4 = inlined_call_operand.vmem [shape: bf16[32,64], index: 4, kind: input, shape index: {}]   ;;  %s1334_s5 = inlined_call_operand.vmem [shape: f32[1,64], index: 5, kind: input, shape index: {}]   ;;  %s1335_s6 = inlined_call_operand.vmem [shape: bf16[64,128], index: 6, kind: input, shape index: {}]   ;;  %s1336_s7 = inlined_call_operand.vmem [shape: f32[1,128], index: 7, kind: input, shape index: {}]   ;;  %s1337_s8 = inlined_call_operand.vmem [shape: f32[1,128], index: 8, kind: input, shape index: {}]   ;;  %s1338_s9 = inlined_call_operand.vmem [shape: f32[1,128], index: 9, kind: input, shape index: {}]   ;;  %s1339_s10 = inlined_call_operand.hbm [shape: f32[2,8,128], index: 10, kind: output, shape index: {}]  }
   0x1   :  { %1340 = sst [smem:[#allocation6_spill]] %s1329_s0 }
   0x2   :  { %15 = vsyncpa [#allocation4], 0 }
   0x3   :  { %17 = vsyncpa [#allocation4 + $0x1], 0  ;;  %s1171_s13 = smov 0   ;;  %s1173_s14 = smov 0  }
   0x4   :  { %s1175_s15 = smov 0   ;;  %s1177_s16 = smov 0  }
   0x5   :  { %s1179_s17 = smov 0   ;;  %s1181_s18 = smov 0  }
   0x6 LB: > { %s894_s19 = sadd.s32 4294967295, %s1112_s18   ;;  %s895_s20 = sadd.s32 4294967294, %s1112_s18   ;;  %s1112_s18 = sphi %s1181_s18, %s23_s18   ;;  %s1108_s17 = sphi %s1179_s17, %s1348_s17   ;;  %s1104_s16 = sphi %s1177_s16, %s1347_s16   ;;  %s1100_s15 = sphi %s1175_s15, %s1346_s15   ;;  %s1096_s14 = sphi %s1173_s14, %s1345_s14   ;;  %s1092_s13 = sphi %s1171_s13, %s1344_s13  }
   0x7   : > { %s35_s21 = sadd.s32 1, %s1108_s17  ;;  %s266_s22 = sadd.s32 1, %s1100_s15 }
   0x8   : > { %p37_p0 = scmp.ge.s32.totalorder %s35_s21, 2  ;;  %p276_p1 = scmp.ne.s32.totalorder %s1100_s15, %s1096_s14 }
   0x9   : > { %p277_p2 = scmp.eq.s32.totalorder %s894_s19, 1  ;;  %p282_p3 = scmp.ne.s32.totalorder %s1096_s14, %s1092_s13 }
   0xa   : > { %s1350_s21 = smov (%p37_p0, %s35_s21), 0  ;;  %p283_p5 = scmp.eq.s32.totalorder %s895_s20, 1 }
   0xb   : > { %p1211_p4 = por %p277_p2, %p276_p1  ;;  %s263_s24 = ssub.s32 %s1108_s17, %s1350_s21 }
   0xc   : > { %p898_p6 = scmp.ge.s32.totalorder %s1112_s18, 1  ;;  %p264_p7 = scmp.eq.s32.totalorder %s263_s24, 0 }
   0xd   : > { %p1218_p8 = por %p283_p5, %p282_p3  ;;  %p347_p9 = scmp.lt.s32.totalorder %s1112_s18, 3 }
   0xe   : > { %s1224_s26 = scalar_select %p264_p7, %s1100_s15, %s266_s22  }
   0xf   : > { %p348_p10 = pnand %p898_p6, %p347_p9 }
  0x10   : > { %v1025_v0 = vld [vmem:[%s1331_s2] sm:$0xff] (!%p348_p10)   ;;  %s900_s29 = sshll.u32 (!%p348_p10), %s1104_s16, 2  ;;  %s1343_s0 = sld [smem:[#allocation6_spill]] (!%p348_p10)  ;;  %vm443_vm0 = vcmask (!%p348_p10), 130048   ;;  %v1029_v4 = vld [vmem:[%s1333_s4 + $0x8] sm:$0xff] (!%p348_p10)   ;;  %vm528_vm1 = vcmask (!%p348_p10), 261120  }
  0x11   : > { %351 = sbr.rel (%p348_p10) target bundleno = 731 (0x2db), region = 60  ;;  %p394_p11 = scmp.lt.s32.totalorder (!%p348_p10), %s900_s29, 7  ;;  %941 = vmatprep.subr.bf16.mxu1 (!%p348_p10), %v1025_v0  ;;  %v1028_v3 = vld [vmem:[%s1333_s4] sm:$0xff] (!%p348_p10)   ;;  %v1031_v6 = vld [vmem:[%s1335_s6 + $0x8] sm:$0xff] (!%p348_p10)   ;;  %v1032_v22 = vld [vmem:[%s1335_s6 + $0x10] sm:$0xff] (!%p348_p10)   ;;  %v1114_v24 = vmov (!%p348_p10), 0  }
  0x12   : > { %942 = vmatpush3.bf16.msra.mxu1 (!%p348_p10), %v1025_v0  ;;  %v1030_v5 = vld [vmem:[%s1335_s6] sm:$0xff] (!%p348_p10)   ;;  %v1033_v23 = vld [vmem:[%s1335_s6 + $0x18] sm:$0xff] (!%p348_p10)   ;;  %1024 = vset.pattern.permute.xlu1 (!%p348_p10), %v1114_v24  ;;  %vm629_vm10 = vcmask (!%p348_p10), 523264   ;;  %s389_s12 = sand.u32 (!%p348_p10), 1, %s1096_s14  }
  0x13   : > { %947 = vmatprep.subr.bf16.mxu1 (!%p348_p10), %v1028_v3  ;;  %955 = vmatprep.subr.bf16.mxu0 (!%p348_p10), %v1030_v5  ;;  %v904_v7 = vld [vmem:[%s1332_s3] ss:$0 sm:$0xff] (!%p348_p10) }
  0x14   : > { %956 = vmatpush3.bf16.msra.mxu0 (!%p348_p10), %v1030_v5  ;;  %1023 = vset.pattern.permute.xlu0 (!%p348_p10), %v1114_v24  ;;  %v910_v37 = vld [vmem:[%s1334_s5] ss:$0 sm:$0xff] (!%p348_p10) }
  0x15   : > { %957 = vmatprep.subr.bf16.mxu0 (!%p348_p10), %v1031_v6  ;;  %v915_v56 = vld [vmem:[%s1336_s7] ss:$0 sm:$0xff] (!%p348_p10) }
  0x16   : > { %v922_v62 = vld [vmem:[%s1337_s8] ss:$0 sm:$0xff] (!%p348_p10) }
  0x18   : > { %s1352_s29 = smov (!%p394_p11, %s900_s29), 7  ;;  %958 = vmatpush3.bf16.msra.mxu0 %v1031_v6 }
  0x19   : > { %s901_s30 = sshll.u32 %s1352_s29, 2  ;;  %959 = vmatprep.subr.bf16.mxu0 %v1032_v22  ;;  %s903_s11 = sshll.u32 %s1352_s29, 3 }
  0x1a   : > { %s397_s19 = scalar_lea.vmem %s1343_s0, %s901_s30  ;;  %s925_s29 = sshll.u32 %s1104_s16, 7 }
  0x1b   : > { %v1026_v1 = vld [vmem:[%s397_s19] sm:$0xff]   ;;  %v1027_v2 = vld [vmem:[%s397_s19 + $0x8] sm:$0xff]   ;;  %s405_s19 = scalar_lea.vmem %s1330_s1, %s903_s11  ;;  %s1282_s28 = scalar_lea.hbm %s1339_s10, %s925_s29 }
  0x1c   : > { %943 = vmatprep.mubr.msk.bf16.mxu1 %vm443_vm0, %v1026_v1  ;;  %960 = vmatpush3.bf16.msra.mxu0 %v1032_v22  ;;  %v713_v25 = vld [vmem:[%s405_s19 + $0x10] sm:$0xff]  ;;  %v711_v26 = vld [vmem:[%s405_s19] sm:$0xff]  ;;  %v714_v27 = vld [vmem:[%s405_s19 + $0x18] sm:$0xff]  ;;  %s802_s11 = scalar_lea.sflag [#allocation4], %s389_s12  ;;  %s1115_s16 = smov [#allocation3]  }
  0x1d   : > { %944 = vmatmul.mubr.msk.bf16.vlgmr.msra.gmra.mrb[0].mxu1 %vm443_vm0, %v1027_v2  ;;  %961 = vmatprep.subr.bf16.mxu0 %v1033_v23  ;;  %vm717_vm2 = vcmp.eq.s32.totalorder %v713_v25, 0  ;;  %vm715_vm3 = vcmp.eq.s32.totalorder %v711_v26, 0  ;;  %vm718_vm4 = vcmp.eq.s32.totalorder %v714_v27, 0  ;;  %v712_v28 = vld [vmem:[%s405_s19 + $0x8] sm:$0xff]  ;;  %vm752_vm7 = vcmp.eq.s32.totalorder %v711_v26, 1  ;;  %s899_s19 = sshll.u32 %s389_s12, 3 }
  0x1e   : > { %948 = vmatpush3.bf16.msra.mxu1 %v1028_v3  ;;  %v721_v29 = vsel %vm717_vm2, 1, %v1114_v24  ;;  %v719_v30 = vsel %vm715_vm3, 1, %v1114_v24  ;;  %vm716_vm5 = vcmp.eq.s32.totalorder %v712_v28, 0  ;;  %v722_v31 = vsel %vm718_vm4, 1, %v1114_v24  ;;  %s391_s20 = scalar_lea.vmem [#allocation3], %s899_s19  ;;  %s1038_s19 = sshll.u32 %s1115_s16, 4  ;;  %s1039_s19 = int_to_ptr.vmem [resolvable:$false] %s1038_s19 }
  0x1f   : > { %949 = vmatprep.subr.bf16.mxu1 %v1029_v4  ;;  %730 = vperm.xlu1 %1024, %v721_v29   ;;  %v720_v32 = vsel %vm716_vm5, 1, %v1114_v24  ;;  %vm753_vm6 = vcmp.eq.s32.totalorder %v712_v28, 1  ;;  %v756_v34 = vsel %vm752_vm7, 1, %v1114_v24  ;;  %vm755_vm8 = vcmp.eq.s32.totalorder %v714_v27, 1  ;;  %s815_s22 = sshll.u32 %s391_s20, 4  ;;  %s1040_s0 = scalar_lea.vmem %s1039_s19, 256  ;;  %s1284_s22 = int_to_ptr.vmem [resolvable:$true] %s815_s22 }
  0x20   : > { %962 = vmatpush3.bf16.msra.mxu0 %v1033_v23  ;;  %724 = vperm.xlu0 %1023, %v719_v30   ;;  %v757_v33 = vsel %vm753_vm6, 1, %v1114_v24  ;;  %vm754_vm9 = vcmp.eq.s32.totalorder %v713_v25, 1  ;;  %v759_v35 = vsel %vm755_vm8, 1, %v1114_v24  ;;  %vm789_vm3 = vcmask 1040384   ;;  %s1034_s30 = scalar_lea.vmem %s1284_s22, 128  ;;  %p1041_p1 = scmp.lt.s32.totalorder %s1284_s22, %s1039_s19 }
  0x21   : > { %v758_v36 = vsel %vm754_vm9, 1, %v1114_v24  ;;  %vm791_vm4 = vcmask 1041408   ;;  %p1035_p12 = scmp.ne.s32.totalorder %s1284_s22, %s1034_s30  ;;  %p1042_p2 = scmp.lt.s32.totalorder %s1040_s0, %s1034_s30 }
  0x22   : > { %950 = vmatpush3.bf16.msra.mxu1 %v1029_v4  ;;  %v923_v4 = vld [vmem:[%s1338_s9] ss:$0 sm:$0xff] }
  0x23   : > { %733 = vperm.xlu1 %1024, %v722_v31   ;;  %p1036_p13 = pnand %p1035_p12, %p1211_p4  ;;  %p1043_p3 = por %p1042_p2, %p1041_p1 }
  0x24   : > { %727 = vperm.xlu0 %1023, %v720_v32  }
  0x25   : > { %p1037_p0 = pneg %p1036_p13 }
  0x27   : > { %764 = vperm.xlu1 %1024, %v757_v33   ;;  %p1044_p5 = pnand %p1043_p3, %p1037_p0 }
  0x28   : > { %761 = vperm.xlu0 %1023, %v756_v34  }
  0x2b   : > { %770 = vperm.xlu1 %1024, %v759_v35  }
  0x2c   : > { %767 = vperm.xlu0 %1023, %v758_v36  }
  0x9e   : > { %v731_v52 = vpop.permute.xlu1 %730 }
  0x9f   : > { %v725_v53 = vpop.permute.xlu0 %724  ;;  %vm737_vm11 = vcmp.eq.s32.totalorder %v731_v52, 1 }
  0xa0   : > { %vm735_vm12 = vcmp.eq.s32.totalorder %v725_v53, 1 }
  0xa2   : > { %v734_v54 = vpop.permute.xlu1 %733 }
  0xa3   : > { %v728_v55 = vpop.permute.xlu0 %727  ;;  %vm738_vm13 = vcmp.eq.s32.totalorder %v734_v54, 1 }
  0xa4   : > { %vm736_vm14 = vcmp.eq.s32.totalorder %v728_v55, 1 }
  0xa6   : > { %v765_v57 = vpop.permute.xlu1 %764 }
  0xa7   : > { %v762_v58 = vpop.permute.xlu0 %761  ;;  %vm773_vm15 = vcmp.eq.s32.totalorder %v765_v57, 1 }
  0xa8   : > { %vm772_vm0 = vcmp.eq.s32.totalorder %v762_v58, 1 }
  0xf0   : > { %v945_v8 = vpop.f32.mrb[0].mxu1 }
  0xf1   : > { %v493_v9 = vadd.f32 %v945_v8, %v904_v7  ;;  %v484_v10 = vpop.f32.mrb[1].mxu1 }
  0xf2   : > { %v485_v11 = vadd.f32 %v904_v7, %v484_v10  ;;  %v946_v12 = vpop.f32.mrb[2].mxu1  ;;  %v768_v10 = vpop.permute.xlu0 %767 }
  0xf3   : > { %v496_v13 = vadd.f32 %v946_v12, %v904_v7  ;;  %v487_v14 = vpop.f32.mrb[3].mxu1  ;;  %v501_v16 = vmax.f32 %v493_v9, 0.0  ;;  %v771_v9 = vpop.permute.xlu1 %770  ;;  %vm774_vm2 = vcmp.eq.s32.totalorder %v768_v10, 1 }
  0xf4   : > { %v488_v15 = vadd.f32 %v904_v7, %v487_v14  ;;  %v499_v18 = vmax.f32 %v485_v11, 0.0 }
  0xf5   : > { %v502_v17 = vmax.f32 %v496_v13, 0.0 }
  0xf6   : > { %v500_v19 = vmax.f32 %v488_v15, 0.0 }
  0xf7   : > { %v504_v20 = vpack.c.bf16 %v502_v17, %v501_v16 }
  0xf8   : > { %v503_v21 = vpack.c.bf16 %v500_v19, %v499_v18 }
  0xfa   : > { %951 = vmatprep.mubr.msk.bf16.mxu1 %vm528_vm1, %v503_v21 }
  0xfb   : > { %952 = vmatmul.mubr.msk.bf16.vlgmr.msra.gmra.mrb[4].mxu1 %vm528_vm1, %v504_v20  ;;  %vm775_vm1 = vcmp.eq.s32.totalorder %v771_v9, 1 }
 0x1ce   : > { %v953_v38 = vpop.f32.mrb[4].mxu1 }
 0x1cf   : > { %v578_v39 = vadd.f32 %v953_v38, %v910_v37  ;;  %v569_v40 = vpop.f32.mrb[5].mxu1 }
 0x1d0   : > { %v570_v41 = vadd.f32 %v910_v37, %v569_v40  ;;  %v954_v42 = vpop.f32.mrb[6].mxu1 }
 0x1d1   : > { %v581_v43 = vadd.f32 %v954_v42, %v910_v37  ;;  %v572_v44 = vpop.f32.mrb[7].mxu1  ;;  %v586_v46 = vmax.f32 %v578_v39, 0.0 }
 0x1d2   : > { %v573_v45 = vadd.f32 %v910_v37, %v572_v44  ;;  %v584_v48 = vmax.f32 %v570_v41, 0.0 }
 0x1d3   : > { %v587_v47 = vmax.f32 %v581_v43, 0.0 }
 0x1d4   : > { %v585_v49 = vmax.f32 %v573_v45, 0.0 }
 0x1d5   : > { %v589_v50 = vpack.c.bf16 %v587_v47, %v586_v46 }
 0x1d6   : > { %v588_v51 = vpack.c.bf16 %v585_v49, %v584_v48 }
 0x1d8   : > { %963 = vmatprep.mubr.msk.bf16.mxu0 %vm629_vm10, %v588_v51 }
 0x1d9   : > { %964 = vmatmul.mubr.msk.bf16.vlgmr.msra.gmra.mrb[0].mxu0 %vm629_vm10, %v589_v50 }
 0x2ac   : > { %v965_v59 = vpop.f32.mrb[0].mxu0 }
 0x2ad   : > { %v679_v60 = vadd.f32 %v965_v59, %v915_v56  ;;  %v670_v61 = vpop.f32.mrb[1].mxu0 }
 0x2ae   : > { %v671_v63 = vadd.f32 %v915_v56, %v670_v61  ;;  %v966_v0 = vpop.f32.mrb[2].mxu0 }
 0x2af   : > { %v687_v1 = vmax.f32 %v679_v60, 0.0  ;;  %v682_v2 = vadd.f32 %v966_v0, %v915_v56  ;;  %v673_v3 = vpop.f32.mrb[3].mxu0 }
 0x2b0   : > { %v685_v5 = vmax.f32 %v671_v63, 0.0  ;;  %v674_v6 = vadd.f32 %v915_v56, %v673_v3 }
 0x2b1   : > { %v698_v7 = vmul.f32 %v922_v62, %v687_v1  ;;  %v688_v8 = vmax.f32 %v682_v2, 0.0 }
 0x2b2   : > { %v696_v11 = vmul.f32 %v922_v62, %v685_v5  ;;  %v686_v12 = vmax.f32 %v674_v6, 0.0 }
 0x2b3   : > { %v709_v13 = vadd.f32 %v923_v4, %v698_v7  ;;  %v699_v14 = vmul.f32 %v922_v62, %v688_v8 }
 0x2b4   : > { %v707_v15 = vadd.f32 %v923_v4, %v696_v11  ;;  %v697_v16 = vmul.f32 %v922_v62, %v686_v12 }
 0x2b5   : > { %v710_v17 = vadd.f32 %v923_v4, %v699_v14  ;;  %v741_v18 = vsel %vm737_vm11, %v709_v13, -3.4028235e+38  ;;  %v778_v19 = vsel %vm774_vm2, %v709_v13, -3.4028235e+38 }
 0x2b6   : > { %v739_v20 = vsel %vm735_vm12, %v707_v15, -3.4028235e+38  ;;  %v708_v21 = vadd.f32 %v923_v4, %v697_v16  ;;  %v776_v22 = vsel %vm772_vm0, %v707_v15, -3.4028235e+38 }
 0x2b7   : > { %v742_v23 = vsel %vm738_vm13, %v710_v17, -3.4028235e+38  ;;  %v779_v24 = vsel %vm775_vm1, %v710_v17, -3.4028235e+38 }
 0x2b8   : > { %v744_v25 = vmax.f32 %v741_v18, %v742_v23  ;;  %v781_v26 = vmax.f32 %v778_v19, %v779_v24  ;;  %v740_v27 = vsel %vm736_vm14, %v708_v21, -3.4028235e+38  ;;  %v777_v28 = vsel %vm773_vm15, %v708_v21, -3.4028235e+38 }
 0x2b9   : > { %v743_v29 = vmax.f32 %v739_v20, %v740_v27  ;;  %v780_v30 = vmax.f32 %v776_v22, %v777_v28 }
 0x2bb   : > { %v745_v31 = vmax.f32 %v743_v29, %v744_v25  ;;  %v782_v32 = vmax.f32 %v780_v30, %v781_v26 }
 0x2bd   : > { %v746_v33 = vrot.slane %v745_v31, 4  ;;  %v783_v34 = vrot.slane %v782_v32, 4 }
 0x2bf   : > { %v747_v35 = vmax.f32 %v745_v31, %v746_v33  ;;  %v784_v36 = vmax.f32 %v782_v32, %v783_v34 }
 0x2c1   : > { %v748_v37 = vrot.slane %v747_v35, 2  ;;  %v785_v38 = vrot.slane %v784_v36, 2 }
 0x2c3   : > { %v749_v39 = vmax.f32 %v747_v35, %v748_v37  ;;  %v786_v40 = vmax.f32 %v784_v36, %v785_v38 }
 0x2c5   : > { %v750_v41 = vrot.slane %v749_v39, 1  ;;  %v787_v42 = vrot.slane %v786_v40, 1 }
 0x2c7   : > { %v751_v43 = vmax.f32 %v749_v39, %v750_v41  ;;  %v788_v44 = vmax.f32 %v786_v40, %v787_v42 }
 0x2c9   : > { %v790_v45 = vsel %vm789_vm3, %v751_v43, %v788_v44 }
 0x2ca   : > { %v792_v46 = vsel %vm791_vm4, %v790_v45, -3.4028235e+38 }
 0x2cb   : > { %v794_v47 = vmax.f32 %v792_v46, -3.4028235e+38 }
 0x2cd   : > { %800 = vst [vmem:[%s391_s20] sm:$0xff] %v794_v47 }
 0x2ce   : > { %1047 = shalt.err (!%p1044_p5)
}
 0x2cf   : > { %s1048_s12 = scalar_lea.hbm %s1282_s28, 128  ;;  %s1052_s24 = scalar_lea.hbm %s1339_s10, 256 }
 0x2d0   : > { %p1049_p6 = scmp.ne.s32.totalorder %s1282_s28, %s1048_s12  ;;  %p1053_p10 = scmp.lt.u32.totalorder %s1282_s28, %s1339_s10 }
 0x2d1   : > { %p1054_p11 = scmp.lt.u32.totalorder %s1052_s24, %s1048_s12  ;;  %p1056_p13 = scmp.lt.u32.totalorder %s1048_s12, %s1282_s28 }
 0x2d2   : > { %p1050_p7 = pnand %p1049_p6, %p1211_p4 }
 0x2d3   : > { %p1055_p12 = por %p1054_p11, %p1053_p10 }
 0x2d4   : > { %p1051_p9 = pneg %p1050_p7 }
 0x2d5   : > { %p1057_p0 = por %p1056_p13, %p1055_p12 }
 0x2d7   : > { %p1058_p1 = pnand %p1057_p0, %p1051_p9 }
 0x2d9   : > { %1061 = shalt.err (!%p1058_p1)
}
 0x2da   : > { %967 = dma.vmem_to_hbm [thread:$0]  (%p1211_p4), %s1284_s22, 128, %s1282_s28, %s802_s11  }
 0x2db PF: > { %p973_p2 = scmp.ge.s32.totalorder %s1112_s18, 2  ;;  %s827_s0 = sand.u32 1, %s1092_s13  }
 0x2dc   : > { %s828_s30 = scalar_lea.sflag [#allocation4], %s827_s0 }
 0x2dd   : > { %p970_p3 = pnand %p973_p2, %p1218_p8 }
 0x2df   : > { %1087 = dma.done.wait (!%p970_p3), %s828_s30, 128  }
 0x2e0   : > { %1089 = vsyncadd (!%p970_p3), %s828_s30, 4294967168  ;;  %s23_s18 = sadd.s32 1, %s1112_s18   ;;  %s1344_s13 = smov %s1096_s14 }
 0x2e1   : > { %p20_p5 = scmp.ge.s32.totalorder %s23_s18, 4   ;;  %s1345_s14 = smov %s1100_s15 }
 0x2e2   : > { %s1346_s15 = smov %s1224_s26  ;;  %s1347_s16 = smov %s1108_s17 }
 0x2e3   : > { %s1348_s17 = smov %s1350_s21  ;;  %22 = sbr.rel (!%p20_p5) target bundleno = 6 (0x6), region = 106 }
 0x2ea   :  { %833 = vsyncpa [#allocation4], 1 }
 0x2eb   :  { %835 = vsyncpa [#allocation4 + $0x1], 1 }

</bundles_post_ra>
